<compile_context>
chip_gen: v6e
topology: v6e:2x2x1
jax: 0.10.0
libtpu: 0.0.40
codegen_flags: <defaults>
</compile_context>

<pallas_src>
import functools

import jax
import jax.numpy as jnp
from jax import lax
from jax.experimental import pallas as pl
from jax.experimental.pallas import tpu as pltpu


# ---------------------------------------------------------------------------
# Tiling helpers
# ---------------------------------------------------------------------------

# Conservative double-buffered tile budget; fits comfortably under v7x's
# 64 MiB VMEM (v5e/v6e have 128 MiB).
_VMEM_TILE_BUDGET = 48 * 1024 * 1024
_VMEM_LIMIT_BYTES = 64 * 1024 * 1024


def _pick_block_rows(n_rows, bytes_per_row):
    """Largest row-tile whose double-buffered working set fits the budget."""
    cap = max(1, _VMEM_TILE_BUDGET // (2 * max(1, bytes_per_row)))
    if n_rows <= cap:
        return n_rows                       # whole array: single grid step
    best = None
    upper = min(cap, n_rows, 8192)
    for d in range(8, upper + 1, 8):        # sublane-aligned divisors of n_rows
        if n_rows % d == 0:
            best = d
    return best if best is not None else n_rows


def _lane_dense_shape(total_elems, fallback_rows, fallback_cols):
    """Repack an elementwise problem so the last dim is a big multiple of 128."""
    for w in (8192, 4096, 2048, 1024, 512, 256, 128):
        if total_elems % w == 0:
            return total_elems // w, w
    return fallback_rows, fallback_cols


def _dropout_threshold(p):
    # keep iff bits >= threshold  ->  P(keep) = 1 - p
    return min(int(p * (2 ** 32)), 2 ** 32 - 1)


# ----------------------------- Pallas kernels ------------------------------


def _layernorm_kernel(x_ref, gamma_ref, beta_ref, o_ref, *, eps):
    """Row-wise LayerNorm (PyTorch biased variance), one-pass statistics."""
    x = x_ref[...].astype(jnp.float32)
    inv_n = 1.0 / x.shape[-1]
    s1 = jnp.sum(x, axis=-1, keepdims=True)
    s2 = jnp.sum(x * x, axis=-1, keepdims=True)
    mean = s1 * inv_n
    var = jnp.maximum(s2 * inv_n - mean * mean, 0.0)
    y = (x - mean) * lax.rsqrt(var + eps)
    y = y * gamma_ref[...].astype(jnp.float32) + beta_ref[...].astype(jnp.float32)
    o_ref[...] = y.astype(o_ref.dtype)


def _add_dropout_kernel(x_ref, y_ref, bits_ref, o_ref, *, threshold, scale):
    """out = x + dropout(y): keep where bits >= threshold, scale by 1/(1-p)."""
    keep = bits_ref[...] >= jnp.uint32(threshold)
    y = y_ref[...].astype(jnp.float32)
    o_ref[...] = (x_ref[...].astype(jnp.float32)
                  + jnp.where(keep, y * scale, 0.0)).astype(o_ref.dtype)


def _add_dropout_layernorm_kernel(x_ref, y_ref, bits_ref, gamma_ref, beta_ref,
                                  o_ref, *, eps, threshold, scale):
    """Fused post-LN path: out = LayerNorm(x + dropout(y))."""
    keep = bits_ref[...] >= jnp.uint32(threshold)
    y = y_ref[...].astype(jnp.float32)
    z = x_ref[...].astype(jnp.float32) + jnp.where(keep, y * scale, 0.0)
    inv_n = 1.0 / z.shape[-1]
    s1 = jnp.sum(z, axis=-1, keepdims=True)
    s2 = jnp.sum(z * z, axis=-1, keepdims=True)
    mean = s1 * inv_n
    var = jnp.maximum(s2 * inv_n - mean * mean, 0.0)
    h = (z - mean) * lax.rsqrt(var + eps)
    h = h * gamma_ref[...].astype(jnp.float32) + beta_ref[...].astype(jnp.float32)
    o_ref[...] = h.astype(o_ref.dtype)


# ------------------------------ host wrappers -------------------------------


def _layer_norm_2d(x2d, gamma, beta, *, eps):
    R, H = x2d.shape
    br = _pick_block_rows(R, H * (2 * x2d.dtype.itemsize))
    return pl.pallas_call(
        functools.partial(_layernorm_kernel, eps=eps),
        out_shape=jax.ShapeDtypeStruct((R, H), x2d.dtype),
        grid_spec=pltpu.PrefetchScalarGridSpec(
            num_scalar_prefetch=0,
            grid=(R // br,),
            in_specs=[
                pl.BlockSpec((br, H), lambda i: (i, 0)),
                pl.BlockSpec((1, H), lambda i: (0, 0)),
                pl.BlockSpec((1, H), lambda i: (0, 0)),
            ],
            out_specs=pl.BlockSpec((br, H), lambda i: (i, 0)),
        ),
        compiler_params=pltpu.CompilerParams(
            dimension_semantics=("parallel",),
            vmem_limit_bytes=_VMEM_LIMIT_BYTES),
    )(x2d, gamma, beta)


def _residual_dropout_2d(x2d, y2d, *, p, key):
    """x + dropout(y), repacked lane-dense (purely elementwise)."""
    R, H = x2d.shape
    rows, W = _lane_dense_shape(R * H, R, H)
    xf = x2d.reshape(rows, W)
    yf = y2d.reshape(rows, W)
    bits = jax.random.bits(key, (rows, W), dtype=jnp.uint32)
    br = _pick_block_rows(rows, W * (3 * x2d.dtype.itemsize + 4))
    out = pl.pallas_call(
        functools.partial(_add_dropout_kernel,
                          threshold=_dropout_threshold(p),
                          scale=1.0 / (1.0 - p)),
        out_shape=jax.ShapeDtypeStruct((rows, W), x2d.dtype),
        grid_spec=pltpu.PrefetchScalarGridSpec(
            num_scalar_prefetch=0,
            grid=(rows // br,),
            in_specs=[pl.BlockSpec((br, W), lambda i: (i, 0))] * 3,
            out_specs=pl.BlockSpec((br, W), lambda i: (i, 0)),
        ),
        compiler_params=pltpu.CompilerParams(
            dimension_semantics=("parallel",),
            vmem_limit_bytes=_VMEM_LIMIT_BYTES),
    )(xf, yf, bits)
    return out.reshape(R, H)


def _add_dropout_layer_norm_2d(x2d, y2d, gamma, beta, *, p, eps, key):
    """Fused LayerNorm(x + dropout(y)) — single HBM round trip."""
    R, H = x2d.shape
    bits = jax.random.bits(key, (R, H), dtype=jnp.uint32)
    br = _pick_block_rows(R, H * (3 * x2d.dtype.itemsize + 4))
    return pl.pallas_call(
        functools.partial(_add_dropout_layernorm_kernel, eps=eps,
                          threshold=_dropout_threshold(p),
                          scale=1.0 / (1.0 - p)),
        out_shape=jax.ShapeDtypeStruct((R, H), x2d.dtype),
        grid_spec=pltpu.PrefetchScalarGridSpec(
            num_scalar_prefetch=0,
            grid=(R // br,),
            in_specs=[
                pl.BlockSpec((br, H), lambda i: (i, 0)),
                pl.BlockSpec((br, H), lambda i: (i, 0)),
                pl.BlockSpec((br, H), lambda i: (i, 0)),
                pl.BlockSpec((1, H), lambda i: (0, 0)),
                pl.BlockSpec((1, H), lambda i: (0, 0)),
            ],
            out_specs=pl.BlockSpec((br, H), lambda i: (i, 0)),
        ),
        compiler_params=pltpu.CompilerParams(
            dimension_semantics=("parallel",),
            vmem_limit_bytes=_VMEM_LIMIT_BYTES),
    )(x2d, y2d, bits, gamma, beta)


def sub_layer_forward(x, sublayer, gamma, beta, *, drop_prob, pre_ln=True,
                      training=True, rng_key=None, eps=1e-5):
    """JAX/Pallas equivalent of SubLayer.forward(x, sublayer, pre_ln)."""
    B, S, H = x.shape
    x2d = x.reshape(B * S, H)
    use_dropout = training and drop_prob > 0.0
    if use_dropout and rng_key is None:
        rng_key = jax.random.PRNGKey(0)

    if use_dropout and drop_prob >= 1.0:
        # Dropout zeroes the sublayer branch entirely.
        if pre_ln:
            return x
        return _layer_norm_2d(x2d, gamma, beta, eps=eps).reshape(B, S, H)

    if pre_ln:
        # x + dropout(sublayer(norm(x)))
        normed = _layer_norm_2d(x2d, gamma, beta, eps=eps)
        sub_out = sublayer(normed.reshape(B, S, H)).reshape(B * S, H)
        if use_dropout:
            out2d = _residual_dropout_2d(x2d, sub_out, p=drop_prob, key=rng_key)
        else:
            out2d = x2d + sub_out  # plain add: XLA fuses it, no extra launch
        return out2d.reshape(B, S, H)

    # norm(x + dropout(sublayer(x)))
    sub_out = sublayer(x).reshape(B * S, H)
    if use_dropout:
        out2d = _add_dropout_layer_norm_2d(x2d, sub_out, gamma, beta,
                                           p=drop_prob, eps=eps, key=rng_key)
    else:
        out2d = _layer_norm_2d(x2d + sub_out, gamma, beta, eps=eps)
    return out2d.reshape(B, S, H)

# TODO(synk): the arbitrary `sublayer` callable stays plain JAX; when it is a
# known Linear it could be fused into a Pallas matmul with LN prologue and
# add+dropout epilogue for one fewer HBM round trip.


# --------------------------------- main -------------------------------------


if __name__ == "__main__":
    B, S, H = 2, 8, 32          # batch=2, seq=8, hidden=size=32
    drop_prob = 0.1
    eps = 1e-5

    key = jax.random.PRNGKey(0)
    kx, kw, kb, kd1, kd2 = jax.random.split(key, 5)
    x = jax.random.normal(kx, (B, S, H), dtype=jnp.float32)

    # nn.LayerNorm(size) params, deterministic default init.
    gamma = jnp.ones((1, H), dtype=jnp.float32)
    beta = jnp.zeros((1, H), dtype=jnp.float32)

    # External `sublayer`: small deterministic Linear (plain JAX glue).
    W = jax.random.normal(kw, (H, H), dtype=jnp.float32) * 0.05
    b = jax.random.normal(kb, (H,), dtype=jnp.float32) * 0.01
    sublayer = lambda z: jnp.einsum("bsh,hk->bsk", z, W) + b

    # Training-mode paths (exercise the dropout kernels).
    out_pre = sub_layer_forward(x, sublayer, gamma, beta, drop_prob=drop_prob,
                                pre_ln=True, training=True, rng_key=kd1)
    out_post = sub_layer_forward(x, sublayer, gamma, beta, drop_prob=drop_prob,
                                 pre_ln=False, training=True, rng_key=kd2)
    jax.block_until_ready(out_pre)
    jax.block_until_ready(out_post)
    assert out_pre.shape == (B, S, H) and out_post.shape == (B, S, H)

    # Eval-mode numerical check of the LayerNorm kernels vs pure JAX.
    def ref_ln(z):
        mu = jnp.mean(z, axis=-1, keepdims=True)
        var = jnp.mean((z - mu) ** 2, axis=-1, keepdims=True)
        return (z - mu) / jnp.sqrt(var + eps) * gamma.reshape(H) + beta.reshape(H)

    got_pre = sub_layer_forward(x, sublayer, gamma, beta, drop_prob=drop_prob,
                                pre_ln=True, training=False)
    want_pre = x + sublayer(ref_ln(x))
    got_post = sub_layer_forward(x, sublayer, gamma, beta, drop_prob=drop_prob,
                                 pre_ln=False, training=False)
    want_post = ref_ln(x + sublayer(x))
    assert jnp.allclose(got_pre, want_pre, atol=1e-4, rtol=1e-4)
    assert jnp.allclose(got_post, want_post, atol=1e-4, rtol=1e-4)

    print("KERNEL_OK")
</pallas_src>

<mosaic_0001>
module attributes {stable_mosaic.version = 11 : i64} {
  func.func @_layernorm_kernel(%arg0: i32, %arg1: memref<16x32xf32, #tpu.memory_space<vmem>>, %arg2: memref<1x32xf32, #tpu.memory_space<vmem>>, %arg3: memref<1x32xf32, #tpu.memory_space<vmem>>, %arg4: memref<16x32xf32, #tpu.memory_space<vmem>>) attributes {dimension_semantics = [#tpu.dimension_semantics<parallel>], iteration_bounds = array<i64: 1>, scalar_prefetch = 0 : i64, scratch_operands = 0 : i64, tpu.core_type = #tpu.core_type<tc>, window_params = [{transform_indices = @transform_0, window_bounds = array<i64: 16, 32>}, {pipeline_mode = #tpu.pipeline_mode<synchronous>, transform_indices = @transform_1, window_bounds = array<i64: 1, 32>}, {pipeline_mode = #tpu.pipeline_mode<synchronous>, transform_indices = @transform_2, window_bounds = array<i64: 1, 32>}, {transform_indices = @transform_3, window_bounds = array<i64: 16, 32>}]} {
    %c0 = arith.constant 0 : index
    %c0_0 = arith.constant 0 : index
    %0 = vector.load %arg1[%c0, %c0_0] : memref<16x32xf32, #tpu.memory_space<vmem>>, vector<16x32xf32>
    %cst = arith.constant dense<0.000000e+00> : vector<16xf32>
    %1 = vector.multi_reduction <add>, %0, %cst [1] : vector<16x32xf32> to vector<16xf32>
    %2 = vector.shape_cast %1 : vector<16xf32> to vector<16x1xf32>
    %3 = arith.mulf %0, %0 : vector<16x32xf32>
    %cst_1 = arith.constant dense<0.000000e+00> : vector<16xf32>
    %4 = vector.multi_reduction <add>, %3, %cst_1 [1] : vector<16x32xf32> to vector<16xf32>
    %5 = vector.shape_cast %4 : vector<16xf32> to vector<16x1xf32>
    %cst_2 = arith.constant 3.125000e-02 : f32
    %6 = vector.broadcast %cst_2 : f32 to vector<16x1xf32>
    %7 = arith.mulf %2, %6 : vector<16x1xf32>
    %cst_3 = arith.constant 3.125000e-02 : f32
    %8 = vector.broadcast %cst_3 : f32 to vector<16x1xf32>
    %9 = arith.mulf %5, %8 : vector<16x1xf32>
    %10 = arith.mulf %7, %7 : vector<16x1xf32>
    %11 = arith.subf %9, %10 : vector<16x1xf32>
    %cst_4 = arith.constant 0.000000e+00 : f32
    %12 = vector.broadcast %cst_4 : f32 to vector<16x1xf32>
    %13 = arith.maximumf %11, %12 : vector<16x1xf32>
    %14 = vector.broadcast %7 : vector<16x1xf32> to vector<16x32xf32>
    %15 = arith.subf %0, %14 : vector<16x32xf32>
    %cst_5 = arith.constant 9.99999974E-6 : f32
    %16 = vector.broadcast %cst_5 : f32 to vector<16x1xf32>
    %17 = arith.addf %13, %16 : vector<16x1xf32>
    %18 = math.rsqrt %17 : vector<16x1xf32>
    %19 = vector.broadcast %18 : vector<16x1xf32> to vector<16x32xf32>
    %20 = arith.mulf %15, %19 : vector<16x32xf32>
    %c0_6 = arith.constant 0 : index
    %c0_7 = arith.constant 0 : index
    %21 = vector.load %arg2[%c0_6, %c0_7] : memref<1x32xf32, #tpu.memory_space<vmem>>, vector<1x32xf32>
    %22 = vector.broadcast %21 : vector<1x32xf32> to vector<16x32xf32>
    %23 = arith.mulf %20, %22 : vector<16x32xf32>
    %c0_8 = arith.constant 0 : index
    %c0_9 = arith.constant 0 : index
    %24 = vector.load %arg3[%c0_8, %c0_9] : memref<1x32xf32, #tpu.memory_space<vmem>>, vector<1x32xf32>
    %25 = vector.broadcast %24 : vector<1x32xf32> to vector<16x32xf32>
    %26 = arith.addf %23, %25 : vector<16x32xf32>
    %c0_10 = arith.constant 0 : index
    %c0_11 = arith.constant 0 : index
    %27 = vector.load %arg4[%c0_10, %c0_11] : memref<16x32xf32, #tpu.memory_space<vmem>>, vector<16x32xf32>
    tpu.vector_store %arg4[%c0_10, %c0_11], %26 {strides = array<i32>} : memref<16x32xf32, #tpu.memory_space<vmem>>, vector<16x32xf32>,
    return
  }
  func.func @transform_0(%arg0: i32) -> (i32, i32) {
    %c0_i32 = arith.constant 0 : i32
    %c0_i32_0 = arith.constant 0 : i32
    return %arg0, %c0_i32 : i32, i32
  }
  func.func @transform_1(%arg0: i32) -> (i32, i32) {
    %c0_i32 = arith.constant 0 : i32
    %c0_i32_0 = arith.constant 0 : i32
    %c0_i32_1 = arith.constant 0 : i32
    return %c0_i32, %c0_i32_0 : i32, i32
  }
  func.func @transform_2(%arg0: i32) -> (i32, i32) {
    %c0_i32 = arith.constant 0 : i32
    %c0_i32_0 = arith.constant 0 : i32
    %c0_i32_1 = arith.constant 0 : i32
    return %c0_i32, %c0_i32_0 : i32, i32
  }
  func.func @transform_3(%arg0: i32) -> (i32, i32) {
    %c0_i32 = arith.constant 0 : i32
    %c0_i32_0 = arith.constant 0 : i32
    return %arg0, %c0_i32 : i32, i32
  }
}

</mosaic_0001>

<bundles_post_ra>
// kernel: tpu_custom_call.1
= control target key start
LH: loop header
LB: loop body
LE: loop exit
PB: predicated region body
PF: predicated region fallthrough
CT: control target
= control target key end

     0   :  { %8 = vsyncpa [#allocation3], 0  ;;  %s203_s0 = inlined_call_operand.hbm [shape: f32[16,32], index: 0, kind: input, shape index: {}]   ;;  %s204_s1 = inlined_call_operand.vmem [shape: f32[1,32], index: 1, kind: input, shape index: {}]   ;;  %s205_s2 = inlined_call_operand.vmem [shape: f32[1,32], index: 2, kind: input, shape index: {}]   ;;  %s206_s3 = inlined_call_operand.hbm [shape: f32[16,32], index: 3, kind: output, shape index: {}]  }
   0x1   :  { %9 = vsyncpa [#allocation4], 0  ;;  %s155_s12 = smov [#allocation2]  }
   0x2   :  { %s15_s13 = sshll.u32 %s155_s12, 4  ;;  %s16_s13 = int_to_ptr.vmem [resolvable:$true] %s15_s13 }
   0x3   :  { %s119_s14 = scalar_lea.vmem %s16_s13, 256  ;;  %p124_p1 = scmp.lt.s32.totalorder %s16_s13, %s16_s13 }
   0x4   :  { %p120_p0 = scmp.ne.s32.totalorder %s16_s13, %s119_s14  ;;  %p125_p2 = scmp.lt.s32.totalorder %s119_s14, %s119_s14 }
   0x6   :  { %p126_p3 = por %p125_p2, %p124_p1 }
   0x8   :  { %p127_p4 = pnand %p126_p3, %p120_p0 }
   0xa   :  { %130 = shalt.err (!%p127_p4)
}
   0xb   :  { %s156_s15 = smov 128   ;;  %s157_s16 = smov 8  }
   0xc   :  { %21 = dma.hbm_to_vmem [thread:$0]  %s203_s0, 256, %s16_s13, [#allocation3], %s156_s15, %s156_s15, %s157_s16  }
   0xd   :  { %151 = dma.done.wait [#allocation3], 256  }
   0xe   :  { %152 = vsyncadd [#allocation3], 4294967040  ;;  %vm31_vm0 = vcmask 261120   ;;  %v29_v0 = vld [vmem:[#allocation2] sm:$0xff]  ;;  %v30_v1 = vld [vmem:[#allocation2 + $0x8] sm:$0xff]  ;;  %s158_s22 = smov [#allocation5]  }
   0xf   :  { %v32_v2 = vsel %vm31_vm0, %v29_v0, 0.0  ;;  %v38_v3 = vmul.f32 %v29_v0, %v29_v0  ;;  %v39_v4 = vmul.f32 %v30_v1, %v30_v1  ;;  %v35_v6 = vsel %vm31_vm0, %v30_v1, 0.0  ;;  %v101_v26 = vld [vmem:[%s204_s1] ss:$0 sm:$0xff]  ;;  %s89_s23 = sshll.u32 %s158_s22, 4  ;;  %s90_s23 = int_to_ptr.vmem [resolvable:$true] %s89_s23 }
  0x10   :  { %33 = vadd.xlane.f32.xlu0 %v32_v2  ;;  %v102_v28 = vld [vmem:[%s205_s2] ss:$0 sm:$0xff]  ;;  %s131_s1 = scalar_lea.vmem %s90_s23, 256  ;;  %p136_p6 = scmp.lt.s32.totalorder %s90_s23, %s90_s23 }
  0x11   :  { %v40_v5 = vsel %vm31_vm0, %v38_v3, 0.0  ;;  %v43_v7 = vsel %vm31_vm0, %v39_v4, 0.0  ;;  %p132_p5 = scmp.ne.s32.totalorder %s90_s23, %s131_s1  ;;  %p137_p7 = scmp.lt.s32.totalorder %s131_s1, %s131_s1 }
  0x12   :  { %41 = vadd.xlane.f32.xlu1 %v40_v5 }
  0x13   :  { %p138_p8 = por %p137_p7, %p136_p6 }
  0x14   :  { %36 = vadd.xlane.f32.xlu0 %v35_v6 }
  0x15   :  { %p139_p9 = pnand %p138_p8, %p132_p5 }
  0x16   :  { %44 = vadd.xlane.f32.xlu1 %v43_v7 }
  0x99   :  { %v34_v8 = vpop.xlane.xlu0 %33 }
  0x9a   :  { %v46_v9 = vmul.f32 0.03125, %v34_v8 }
  0x9b   :  { %v42_v10 = vpop.xlane.xlu1 %41 }
  0x9c   :  { %v50_v11 = vmul.f32 %v46_v9, %v46_v9  ;;  %v48_v12 = vmul.f32 0.03125, %v42_v10  ;;  %v56_v24 = vsub.f32 %v29_v0, %v46_v9 }
  0x9d   :  { %v37_v13 = vpop.xlane.xlu0 %36 }
  0x9e   :  { %v52_v14 = vsub.f32 %v48_v12, %v50_v11  ;;  %v47_v15 = vmul.f32 0.03125, %v37_v13 }
  0x9f   :  { %v45_v16 = vpop.xlane.xlu1 %44 }
  0xa0   :  { %v54_v17 = vmax.f32 %v52_v14, 0.0  ;;  %v51_v18 = vmul.f32 %v47_v15, %v47_v15  ;;  %v49_v19 = vmul.f32 0.03125, %v45_v16  ;;  %v57_v29 = vsub.f32 %v30_v1, %v47_v15 }
  0xa2   :  { %v58_v20 = vadd.f32 1e-05, %v54_v17  ;;  %v53_v21 = vsub.f32 %v49_v19, %v51_v18 }
  0xa4   :  { %107 = vrsqrt.f32 %v58_v20  ;;  %v55_v22 = vmax.f32 %v53_v21, 0.0 }
  0xa6   :  { %v59_v23 = vadd.f32 1e-05, %v55_v22 }
  0xa8   :  { %109 = vrsqrt.f32 %v59_v23 }
  0xb1   :  { %v108_v25 = vpop.eup %107 }
  0xb2   :  { %v62_v27 = vmul.f32 %v108_v25, %v56_v24 }
  0xb4   :  { %v71_v30 = vmul.f32 %v101_v26, %v62_v27 }
  0xb5   :  { %v110_v31 = vpop.eup %109 }
  0xb6   :  { %v63_v32 = vmul.f32 %v110_v31, %v57_v29  ;;  %v80_v33 = vadd.f32 %v102_v28, %v71_v30 }
  0xb8   :  { %v72_v34 = vmul.f32 %v101_v26, %v63_v32  ;;  %82 = vst.msk [vmem:[#allocation5] sm:$0xff] %vm31_vm0, %v80_v33 }
  0xba   :  { %v81_v35 = vadd.f32 %v102_v28, %v72_v34 }
  0xbc   :  { %83 = vst.msk [vmem:[#allocation5 + $0x8] sm:$0xff] %vm31_vm0, %v81_v35 }
  0xbd   :  { %142 = shalt.err (!%p139_p9)
}
  0xbe   :  { %95 = dma.vmem_to_hbm [thread:$0]  %s90_s23, 256, %s206_s3, [#allocation4], %s156_s15, %s156_s15, %s157_s16  }
  0xbf   :  { %153 = dma.done.wait [#allocation4], 256  }
  0xc0   :  { %154 = vsyncadd [#allocation4], 4294967040 }
  0xc1   :  { %99 = vsyncpa [#allocation3], 1 }
  0xc2   :  { %100 = vsyncpa [#allocation4], 1 }

</bundles_post_ra>
